<compile_context>
chip_gen: v6e
topology: v6e:2x2x1
jax: 0.10.0
libtpu: 0.0.40
codegen_flags: <defaults>
</compile_context>

<pallas_src>
import functools
import math

import jax
import jax.numpy as jnp
from jax import lax
from jax.experimental import pallas as pl
from jax.experimental.pallas import tpu as pltpu


def _round_up(x, m):
    return (x + m - 1) // m * m


def _cdiv(a, b):
    return (a + b - 1) // b


def _embed_fc_kernel(x_ref, w1_ref, b1_ref, w2_ref, b2_ref, o_ref):
    # First linear: (TB, D) @ (D, E) + (1, E), f32 accumulation on the MXU.
    h = jnp.dot(x_ref[...], w1_ref[...], preferred_element_type=jnp.float32)
    h = h + b1_ref[...]
    # Exact (erf-based) GELU, matching torch.nn.GELU() default.
    h = 0.5 * h * (1.0 + lax.erf(h * (1.0 / math.sqrt(2.0))))
    # Second linear: (TB, E) @ (E, E) + (1, E).
    out = jnp.dot(h, w2_ref[...], preferred_element_type=jnp.float32)
    o_ref[...] = (out + b2_ref[...]).astype(o_ref.dtype)


@functools.partial(jax.jit, static_argnames=("input_dim",))
def embed_fc_forward(x, w1, b1, w2, b2, *, input_dim):
    # Mirror PyTorch: if x.ndim == 1 -> view(-1, input_dim)
    if x.ndim == 1:
        x = x.reshape(-1, input_dim)
    B, D_in = x.shape
    E = w1.shape[1]

    # ---- Pad feature dims to lane-dense multiples of 128. --------------------
    D_pad = _round_up(D_in, 128)
    E_pad = _round_up(E, 128)

    # ---- Adaptive batch tile. -------------------------------------------------
    # Resident bytes: both weights + biases (count x2 for pipeline buffers).
    resident = (D_pad * E_pad + E_pad * E_pad + 2 * E_pad) * 4

    def tile_bytes(tb):
        # double-buffered x & out tiles + f32 hidden / pre-cast accumulator.
        return tb * (2 * D_pad + 4 * E_pad) * 4

    budget = 48 << 20
    base = 256  # target rows per tile (2x the 128 MXU tile)
    while base > 8 and 2 * resident + tile_bytes(base) > budget:
        base //= 2

    # Size the tile so batch padding wastes < 8 rows per tile.
    n_tiles = _cdiv(B, base)
    TB = min(_round_up(_cdiv(B, n_tiles), 8), _round_up(B, 8))
    B_pad = TB * n_tiles

    # ---- Zero-pad (numerically neutral; sliced off afterwards). ---------------
    x_p = jnp.pad(x, ((0, B_pad - B), (0, D_pad - D_in)))
    w1_p = jnp.pad(w1, ((0, D_pad - D_in), (0, E_pad - E)))
    w2_p = jnp.pad(w2, ((0, E_pad - E), (0, E_pad - E)))
    # Biases kept 2-D (1, E_pad) so they live on lanes and broadcast over
    # sublanes inside the kernel.
    b1_p = jnp.pad(b1.reshape(1, E), ((0, 0), (0, E_pad - E)))
    b2_p = jnp.pad(b2.reshape(1, E), ((0, 0), (0, E_pad - E)))

    out = pl.pallas_call(
        _embed_fc_kernel,
        out_shape=jax.ShapeDtypeStruct((B_pad, E_pad), x.dtype),
        grid_spec=pltpu.PrefetchScalarGridSpec(
            num_scalar_prefetch=0,
            grid=(n_tiles,),
            in_specs=[
                # Activations: tiled along batch -> double-buffered DMA.
                pl.BlockSpec((TB, D_pad), lambda i: (i, 0)),
                # Weights / biases: constant index_map -> resident in VMEM.
                pl.BlockSpec((D_pad, E_pad), lambda i: (0, 0)),
                pl.BlockSpec((1, E_pad), lambda i: (0, 0)),
                pl.BlockSpec((E_pad, E_pad), lambda i: (0, 0)),
                pl.BlockSpec((1, E_pad), lambda i: (0, 0)),
            ],
            out_specs=pl.BlockSpec((TB, E_pad), lambda i: (i, 0)),
        ),
        compiler_params=pltpu.CompilerParams(
            # Batch tiles are independent -> megacore sharding where available.
            dimension_semantics=("parallel",),
            # Resident weights + double-buffered tiles can exceed the 16 MiB
            # default scoped limit on v5e; raise it explicitly (<= v7x physical).
            vmem_limit_bytes=64 << 20,
        ),
    )(x_p, w1_p, b1_p, w2_p, b2_p)

    # Strip the padding.
    return out[:B, :E]


def init_params(key, input_dim, emb_dim, dtype=jnp.float32):
    """Deterministic synthetic parameters with nn.Linear-like uniform init."""
    k1, k2, k3, k4 = jax.random.split(key, 4)
    bound1 = 1.0 / math.sqrt(input_dim)
    bound2 = 1.0 / math.sqrt(emb_dim)
    # Stored as (in, out): transpose of PyTorch's (out, in) weight layout.
    w1 = jax.random.uniform(k1, (input_dim, emb_dim), dtype, -bound1, bound1)
    b1 = jax.random.uniform(k2, (emb_dim,), dtype, -bound1, bound1)
    w2 = jax.random.uniform(k3, (emb_dim, emb_dim), dtype, -bound2, bound2)
    b2 = jax.random.uniform(k4, (emb_dim,), dtype, -bound2, bound2)
    return w1, b1, w2, b2


def _reference(x, w1, b1, w2, b2, input_dim):
    if x.ndim == 1:
        x = x.reshape(-1, input_dim)
    h = x @ w1 + b1
    h = 0.5 * h * (1.0 + lax.erf(h / jnp.sqrt(2.0)))
    return h @ w2 + b2


if __name__ == "__main__":
    # Small primary shapes consistent with the module.
    input_dim = 4
    emb_dim = 32
    batch = 2

    key = jax.random.PRNGKey(0)
    kx, kp = jax.random.split(key)
    x = jax.random.normal(kx, (batch, input_dim), jnp.float32)
    w1, b1, w2, b2 = init_params(kp, input_dim, emb_dim)

    out = embed_fc_forward(x, w1, b1, w2, b2, input_dim=input_dim)
    out = jax.block_until_ready(out)

    ref = _reference(x, w1, b1, w2, b2, input_dim)
    assert out.shape == (batch, emb_dim)
    assert jnp.allclose(out, ref, atol=1e-5, rtol=1e-5), "mismatch vs reference"

    # Exercise the 1-D input path (x.ndim == 1 -> view(-1, input_dim)).
    x1d = x.reshape(-1)
    out1d = jax.block_until_ready(
        embed_fc_forward(x1d, w1, b1, w2, b2, input_dim=input_dim)
    )
    assert out1d.shape == (batch, emb_dim)
    assert jnp.allclose(out1d, ref, atol=1e-5, rtol=1e-5)

    # A larger shape to exercise the multi-tile batch grid (grid > 1) and the
    # non-trivial padding/slicing path (B=600 -> 3 tiles of 200 rows, no
    # wasted batch padding).
    B2, D2, E2 = 600, 96, 192
    kx2, kp2 = jax.random.split(jax.random.PRNGKey(1))
    x2 = jax.random.normal(kx2, (B2, D2), jnp.float32)
    p2 = init_params(kp2, D2, E2)
    out2 = jax.block_until_ready(embed_fc_forward(x2, *p2, input_dim=D2))
    ref2 = _reference(x2, *p2, D2)
    assert out2.shape == (B2, E2)
    assert jnp.allclose(out2, ref2, atol=1e-4, rtol=1e-5)

    print("KERNEL_OK")
</pallas_src>

<mosaic_0001>
module attributes {stable_mosaic.version = 11 : i64} {
  func.func @_embed_fc_kernel(%arg0: i32, %arg1: memref<8x128xf32, #tpu.memory_space<vmem>>, %arg2: memref<128x128xf32, #tpu.memory_space<vmem>>, %arg3: memref<1x128xf32, #tpu.memory_space<vmem>>, %arg4: memref<128x128xf32, #tpu.memory_space<vmem>>, %arg5: memref<1x128xf32, #tpu.memory_space<vmem>>, %arg6: memref<8x128xf32, #tpu.memory_space<vmem>>) attributes {dimension_semantics = [#tpu.dimension_semantics<parallel>], iteration_bounds = array<i64: 1>, scalar_prefetch = 0 : i64, scratch_operands = 0 : i64, tpu.core_type = #tpu.core_type<tc>, window_params = [{transform_indices = @transform_0, window_bounds = array<i64: 8, 128>}, {pipeline_mode = #tpu.pipeline_mode<synchronous>, transform_indices = @transform_1, window_bounds = array<i64: 128, 128>}, {pipeline_mode = #tpu.pipeline_mode<synchronous>, transform_indices = @transform_2, window_bounds = array<i64: 1, 128>}, {pipeline_mode = #tpu.pipeline_mode<synchronous>, transform_indices = @transform_3, window_bounds = array<i64: 128, 128>}, {pipeline_mode = #tpu.pipeline_mode<synchronous>, transform_indices = @transform_4, window_bounds = array<i64: 1, 128>}, {transform_indices = @transform_5, window_bounds = array<i64: 8, 128>}]} {
    %c0 = arith.constant 0 : index
    %c0_0 = arith.constant 0 : index
    %0 = vector.load %arg1[%c0, %c0_0] : memref<8x128xf32, #tpu.memory_space<vmem>>, vector<8x128xf32>
    %c0_1 = arith.constant 0 : index
    %c0_2 = arith.constant 0 : index
    %1 = vector.load %arg2[%c0_1, %c0_2] : memref<128x128xf32, #tpu.memory_space<vmem>>, vector<128x128xf32>
    %cst = arith.constant dense<0.000000e+00> : vector<8x128xf32>
    %2 = tpu.matmul %0, %1, %cst {dimension_numbers = #tpu.dot_dimension_numbers<[1], [0], [0], [1], [0, 0, 1, 1], [], []>} : vector<8x128xf32>, vector<128x128xf32>, vector<8x128xf32> -> vector<8x128xf32>
    %c0_3 = arith.constant 0 : index
    %c0_4 = arith.constant 0 : index
    %3 = vector.load %arg3[%c0_3, %c0_4] : memref<1x128xf32, #tpu.memory_space<vmem>>, vector<1x128xf32>
    %4 = vector.broadcast %3 : vector<1x128xf32> to vector<8x128xf32>
    %5 = arith.addf %2, %4 : vector<8x128xf32>
    %cst_5 = arith.constant 5.000000e-01 : f32
    %6 = vector.broadcast %cst_5 : f32 to vector<8x128xf32>
    %7 = arith.mulf %6, %5 : vector<8x128xf32>
    %cst_6 = arith.constant 0.707106769 : f32
    %8 = vector.broadcast %cst_6 : f32 to vector<8x128xf32>
    %9 = arith.mulf %5, %8 : vector<8x128xf32>
    %10 = math.erf %9 : vector<8x128xf32>
    %cst_7 = arith.constant 1.000000e+00 : f32
    %11 = vector.broadcast %cst_7 : f32 to vector<8x128xf32>
    %12 = arith.addf %11, %10 : vector<8x128xf32>
    %13 = arith.mulf %7, %12 : vector<8x128xf32>
    %c0_8 = arith.constant 0 : index
    %c0_9 = arith.constant 0 : index
    %14 = vector.load %arg4[%c0_8, %c0_9] : memref<128x128xf32, #tpu.memory_space<vmem>>, vector<128x128xf32>
    %cst_10 = arith.constant dense<0.000000e+00> : vector<8x128xf32>
    %15 = tpu.matmul %13, %14, %cst_10 {dimension_numbers = #tpu.dot_dimension_numbers<[1], [0], [0], [1], [0, 0, 1, 1], [], []>} : vector<8x128xf32>, vector<128x128xf32>, vector<8x128xf32> -> vector<8x128xf32>
    %c0_11 = arith.constant 0 : index
    %c0_12 = arith.constant 0 : index
    %16 = vector.load %arg5[%c0_11, %c0_12] : memref<1x128xf32, #tpu.memory_space<vmem>>, vector<1x128xf32>
    %17 = vector.broadcast %16 : vector<1x128xf32> to vector<8x128xf32>
    %18 = arith.addf %15, %17 : vector<8x128xf32>
    %c0_13 = arith.constant 0 : index
    %c0_14 = arith.constant 0 : index
    %19 = vector.load %arg6[%c0_13, %c0_14] : memref<8x128xf32, #tpu.memory_space<vmem>>, vector<8x128xf32>
    tpu.vector_store %arg6[%c0_13, %c0_14], %18 {strides = array<i32>} : memref<8x128xf32, #tpu.memory_space<vmem>>, vector<8x128xf32>,
    return
  }
  func.func @transform_0(%arg0: i32) -> (i32, i32) {
    %c0_i32 = arith.constant 0 : i32
    %c0_i32_0 = arith.constant 0 : i32
    return %arg0, %c0_i32 : i32, i32
  }
  func.func @transform_1(%arg0: i32) -> (i32, i32) {
    %c0_i32 = arith.constant 0 : i32
    %c0_i32_0 = arith.constant 0 : i32
    %c0_i32_1 = arith.constant 0 : i32
    return %c0_i32, %c0_i32_0 : i32, i32
  }
  func.func @transform_2(%arg0: i32) -> (i32, i32) {
    %c0_i32 = arith.constant 0 : i32
    %c0_i32_0 = arith.constant 0 : i32
    %c0_i32_1 = arith.constant 0 : i32
    return %c0_i32, %c0_i32_0 : i32, i32
  }
  func.func @transform_3(%arg0: i32) -> (i32, i32) {
    %c0_i32 = arith.constant 0 : i32
    %c0_i32_0 = arith.constant 0 : i32
    %c0_i32_1 = arith.constant 0 : i32
    return %c0_i32, %c0_i32_0 : i32, i32
  }
  func.func @transform_4(%arg0: i32) -> (i32, i32) {
    %c0_i32 = arith.constant 0 : i32
    %c0_i32_0 = arith.constant 0 : i32
    %c0_i32_1 = arith.constant 0 : i32
    return %c0_i32, %c0_i32_0 : i32, i32
  }
  func.func @transform_5(%arg0: i32) -> (i32, i32) {
    %c0_i32 = arith.constant 0 : i32
    %c0_i32_0 = arith.constant 0 : i32
    return %arg0, %c0_i32 : i32, i32
  }
}

</mosaic_0001>

<bundles_post_ra>
// kernel: embed_fc_forward.1
= control target key start
LH: loop header
LB: loop body
LE: loop exit
PB: predicated region body
PF: predicated region fallthrough
CT: control target
= control target key end

     0   :  { %v327_v0 = vmov 0.0   ;;  %vm328_vm0 = vmmov 0   ;;  %s501_s1 = inlined_call_operand.vmem [shape: f32[128,128], index: 1, kind: input, shape index: {}]   ;;  %s502_s3 = inlined_call_operand.vmem [shape: f32[128,128], index: 3, kind: input, shape index: {}]   ;;  %s503_s0 = inlined_call_operand.vmem [shape: f32[8,128], index: 0, kind: input, shape index: {}]   ;;  %s504_s2 = inlined_call_operand.vmem [shape: f32[1,128], index: 2, kind: input, shape index: {}]   ;;  %s505_s4 = inlined_call_operand.vmem [shape: f32[1,128], index: 4, kind: input, shape index: {}]   ;;  %s506_s5 = inlined_call_operand.vmem [shape: f32[8,128], index: 5, kind: output, shape index: {}]  }
   0x1   :  { %253 = vmatprep.subr.mxu0 %v327_v0  ;;  %v36_v1 = vld [vmem:[%s501_s1 + $0x78] sm:$0xff]  ;;  %v35_v2 = vld [vmem:[%s501_s1 + $0x70] sm:$0xff]  ;;  %285 = vmatprep.mubr.msk.f32.mxu0 %vm328_vm0, %v327_v0  ;;  %v34_v3 = vld [vmem:[%s501_s1 + $0x68] sm:$0xff] }
   0x2   :  { %254 = vmatpush3.msra.mxu0 %v36_v1  ;;  %288 = vmatprep.subr.mxu1 %v327_v0  ;;  %v33_v4 = vld [vmem:[%s501_s1 + $0x60] sm:$0xff]  ;;  %v134_v5 = vld [vmem:[%s502_s3 + $0x78] sm:$0xff]  ;;  %v133_v7 = vld [vmem:[%s502_s3 + $0x70] sm:$0xff] }
   0x3   :  { %255 = vmatprep.subr.mxu0 %v327_v0  ;;  %320 = vmatprep.mubr.msk.f32.mxu1 %vm328_vm0, %v327_v0  ;;  %v32_v6 = vld [vmem:[%s501_s1 + $0x58] sm:$0xff]  ;;  %v132_v8 = vld [vmem:[%s502_s3 + $0x68] sm:$0xff]  ;;  %v31_v9 = vld [vmem:[%s501_s1 + $0x50] sm:$0xff] }
   0x4   :  { %256 = vmatpush3.msra.mxu0 %v35_v2  ;;  %289 = vmatpush3.msra.mxu1 %v134_v5  ;;  %v131_v10 = vld [vmem:[%s502_s3 + $0x60] sm:$0xff]  ;;  %v30_v11 = vld [vmem:[%s501_s1 + $0x48] sm:$0xff]  ;;  %v28_v13 = vld [vmem:[%s501_s1 + $0x38] sm:$0xff] }
   0x5   :  { %257 = vmatprep.subr.mxu0 %v327_v0  ;;  %290 = vmatprep.subr.mxu1 %v327_v0  ;;  %v29_v12 = vld [vmem:[%s501_s1 + $0x40] sm:$0xff]  ;;  %v27_v14 = vld [vmem:[%s501_s1 + $0x30] sm:$0xff]  ;;  %v26_v15 = vld [vmem:[%s501_s1 + $0x28] sm:$0xff] }
   0x6   :  { %258 = vmatpush3.msra.mxu0 %v34_v3  ;;  %291 = vmatpush3.msra.mxu1 %v133_v7  ;;  %v25_v16 = vld [vmem:[%s501_s1 + $0x20] sm:$0xff]  ;;  %v24_v17 = vld [vmem:[%s501_s1 + $0x18] sm:$0xff]  ;;  %v23_v18 = vld [vmem:[%s501_s1 + $0x10] sm:$0xff] }
   0x7   :  { %259 = vmatprep.subr.mxu0 %v327_v0  ;;  %292 = vmatprep.subr.mxu1 %v327_v0  ;;  %v22_v19 = vld [vmem:[%s501_s1 + $0x8] sm:$0xff]  ;;  %v21_v20 = vld [vmem:[%s501_s1] sm:$0xff]  ;;  %v130_v22 = vld [vmem:[%s502_s3 + $0x58] sm:$0xff] }
   0x8   :  { %260 = vmatpush3.msra.mxu0 %v33_v4  ;;  %293 = vmatpush3.msra.mxu1 %v132_v8  ;;  %v20_v21 = vld [vmem:[%s503_s0] sm:$0xff]  ;;  %v129_v23 = vld [vmem:[%s502_s3 + $0x50] sm:$0xff]  ;;  %v128_v24 = vld [vmem:[%s502_s3 + $0x48] sm:$0xff] }
   0x9   :  { %261 = vmatprep.subr.mxu0 %v327_v0  ;;  %294 = vmatprep.subr.mxu1 %v327_v0  ;;  %v127_v25 = vld [vmem:[%s502_s3 + $0x40] sm:$0xff]  ;;  %v126_v26 = vld [vmem:[%s502_s3 + $0x38] sm:$0xff]  ;;  %v125_v27 = vld [vmem:[%s502_s3 + $0x30] sm:$0xff] }
   0xa   :  { %262 = vmatpush3.msra.mxu0 %v32_v6  ;;  %295 = vmatpush3.msra.mxu1 %v131_v10  ;;  %v124_v28 = vld [vmem:[%s502_s3 + $0x28] sm:$0xff]  ;;  %v123_v29 = vld [vmem:[%s502_s3 + $0x20] sm:$0xff]  ;;  %v122_v30 = vld [vmem:[%s502_s3 + $0x18] sm:$0xff] }
   0xb   :  { %263 = vmatprep.subr.mxu0 %v327_v0  ;;  %296 = vmatprep.subr.mxu1 %v327_v0  ;;  %v121_v31 = vld [vmem:[%s502_s3 + $0x10] sm:$0xff]  ;;  %v120_v32 = vld [vmem:[%s502_s3 + $0x8] sm:$0xff]  ;;  %v119_v33 = vld [vmem:[%s502_s3] sm:$0xff] }
   0xc   :  { %264 = vmatpush3.msra.mxu0 %v31_v9  ;;  %297 = vmatpush3.msra.mxu1 %v130_v22  ;;  %v217_v34 = vld [vmem:[%s504_s2] ss:$0 sm:$0xff] }
   0xd   :  { %265 = vmatprep.subr.mxu0 %v327_v0  ;;  %298 = vmatprep.subr.mxu1 %v327_v0  ;;  %v218_v43 = vld [vmem:[%s505_s4] ss:$0 sm:$0xff] }
   0xe   :  { %266 = vmatpush3.msra.mxu0 %v30_v11  ;;  %299 = vmatpush3.msra.mxu1 %v129_v23 }
   0xf   :  { %267 = vmatprep.subr.mxu0 %v327_v0  ;;  %300 = vmatprep.subr.mxu1 %v327_v0 }
  0x10   :  { %268 = vmatpush3.msra.mxu0 %v29_v12  ;;  %301 = vmatpush3.msra.mxu1 %v128_v24 }
  0x11   :  { %269 = vmatprep.subr.mxu0 %v327_v0  ;;  %302 = vmatprep.subr.mxu1 %v327_v0 }
  0x12   :  { %270 = vmatpush3.msra.mxu0 %v28_v13  ;;  %303 = vmatpush3.msra.mxu1 %v127_v25 }
  0x13   :  { %271 = vmatprep.subr.mxu0 %v327_v0  ;;  %304 = vmatprep.subr.mxu1 %v327_v0 }
  0x14   :  { %272 = vmatpush3.msra.mxu0 %v27_v14  ;;  %305 = vmatpush3.msra.mxu1 %v126_v26 }
  0x15   :  { %273 = vmatprep.subr.mxu0 %v327_v0  ;;  %306 = vmatprep.subr.mxu1 %v327_v0 }
  0x16   :  { %274 = vmatpush3.msra.mxu0 %v26_v15  ;;  %307 = vmatpush3.msra.mxu1 %v125_v27 }
  0x17   :  { %275 = vmatprep.subr.mxu0 %v327_v0  ;;  %308 = vmatprep.subr.mxu1 %v327_v0 }
  0x18   :  { %276 = vmatpush3.msra.mxu0 %v25_v16  ;;  %309 = vmatpush3.msra.mxu1 %v124_v28 }
  0x19   :  { %277 = vmatprep.subr.mxu0 %v327_v0  ;;  %310 = vmatprep.subr.mxu1 %v327_v0 }
  0x1a   :  { %278 = vmatpush3.msra.mxu0 %v24_v17  ;;  %311 = vmatpush3.msra.mxu1 %v123_v29 }
  0x1b   :  { %279 = vmatprep.subr.mxu0 %v327_v0  ;;  %312 = vmatprep.subr.mxu1 %v327_v0 }
  0x1c   :  { %280 = vmatpush3.msra.mxu0 %v23_v18  ;;  %313 = vmatpush3.msra.mxu1 %v122_v30 }
  0x1d   :  { %281 = vmatprep.subr.mxu0 %v327_v0  ;;  %314 = vmatprep.subr.mxu1 %v327_v0 }
  0x1e   :  { %282 = vmatpush3.msra.mxu0 %v22_v19  ;;  %315 = vmatpush3.msra.mxu1 %v121_v31 }
  0x1f   :  { %283 = vmatprep.subr.mxu0 %v327_v0  ;;  %316 = vmatprep.subr.mxu1 %v327_v0 }
  0x20   :  { %284 = vmatpush3.msra.mxu0 %v21_v20  ;;  %317 = vmatpush3.msra.mxu1 %v120_v32 }
  0x21   :  { %286 = vmatmul.mubr.f32.vlgmr.msra.gmra.mxu0 %v20_v21  ;;  %318 = vmatprep.subr.mxu1 %v327_v0 }
  0x22   :  { %319 = vmatpush3.msra.mxu1 %v119_v33 }
  0xe1   :  { %v110_v35 = vpop.f32.mrf.mxu0 }
  0xe2   :  { %v111_v36 = vadd.f32 %v217_v34, %v110_v35 }
  0xe3   :  { %v287_v37 = vpop.f32.mrf.mxu0 }
  0xe4   :  { %v115_v38 = vmul.f32 0.70710677, %v111_v36  ;;  %v114_v40 = vmul.f32 0.5, %v111_v36 }
  0xe6   :  { %325 = verf.f32 %v115_v38 }
  0xf3   :  { %v326_v39 = vpop.eup %325 }
  0xf4   :  { %v117_v41 = vadd.f32 1.0, %v326_v39 }
  0xf6   :  { %v118_v42 = vmul.f32 %v117_v41, %v114_v40 }
  0xf8   :  { %321 = vmatmul.mubr.f32.vlgmr.msra.gmra.mxu1 %v118_v42 }
 0x1b8   :  { %v208_v44 = vpop.f32.mrf.mxu1 }
 0x1b9   :  { %v209_v45 = vadd.f32 %v218_v43, %v208_v44 }
 0x1ba   :  { %v322_v46 = vpop.f32.mrf.mxu1 }
 0x1bb   :  { %212 = vst [vmem:[%s506_s5] sm:$0xff] %v209_v45 }

</bundles_post_ra>
